<compile_context>
chip_gen: v6e
topology: v6e:2x2x1
jax: 0.10.0
libtpu: 0.0.40
codegen_flags: <defaults>
</compile_context>

<pallas_src>
import functools

import jax
import jax.numpy as jnp
from jax.experimental import pallas as pl
from jax.experimental.pallas import tpu as pltpu


def _cost_kernel(params_ref, x_ref, o_ref, *, n_block):
    """Denormalize -> round -> polynomial cost, fused, lane-dense.

    params_ref: SMEM f32[4*n_block + 1] = [lb | range | quad | lin | const]
    x_ref:      VMEM [d, TILE_N] normalized inputs (candidates on lanes)
    o_ref:      VMEM [1, TILE_N] per-candidate base cost
    """
    tile_n = x_ref.shape[1]
    acc = jnp.zeros((1, tile_n), dtype=jnp.float32)

    # n_block is tiny and static -> unrolled VPU-only loop over sublane rows.
    for j in range(n_block):
        lb_j = params_ref[j]
        rng_j = params_ref[n_block + j]
        quad_j = params_ref[2 * n_block + j]
        lin_j = params_ref[3 * n_block + j]

        xj = x_ref[j:j + 1, :].astype(jnp.float32)        # [1, TILE_N], f32 compute
        xi = jnp.round(lb_j + xj * rng_j)                 # denormalize + round
        acc = acc + quad_j * xi * xi + lin_j * xi

    const = params_ref[4 * n_block]
    o_ref[...] = (acc + const).astype(o_ref.dtype)


def pallas_cost_model(x_norm, lb_block, range_block, quad_w, lin_w, const,
                      *, tile_n=2048):
    """x_norm: [N, d] normalized inputs; returns [N] costs in x_norm.dtype.

    tile_n must be a multiple of 128 (lane width).
    """
    assert tile_n % 128 == 0, "tile_n must be a multiple of 128"
    N, d = x_norm.shape
    n_block = lb_block.shape[0]
    out_dtype = x_norm.dtype

    # Pack all tiny coefficients (+ const) into one SMEM-resident vector.
    params = jnp.concatenate([
        lb_block.astype(jnp.float32),
        range_block.astype(jnp.float32),
        quad_w.astype(jnp.float32),
        lin_w.astype(jnp.float32),
        jnp.asarray([const], dtype=jnp.float32),
    ])

    # Lane-dense layout: candidates N on the lane axis, parameter dims on
    # sublanes.  The BlockSpec DMAs all d rows (d is tiny); the kernel only
    # touches the first n_block rows, so no separate wrapper-side column slice.
    x_t = x_norm.T                                        # [d, N]
    n_pad = ((N + 127) // 128) * 128
    tile = min(tile_n, n_pad)
    n_pad = ((n_pad + tile - 1) // tile) * tile
    if n_pad != N:
        x_t = jnp.pad(x_t, ((0, 0), (0, n_pad - N)))

    grid_n = n_pad // tile
    kernel = functools.partial(_cost_kernel, n_block=n_block)

    out = pl.pallas_call(
        kernel,
        out_shape=jax.ShapeDtypeStruct((1, n_pad), out_dtype),
        grid=(grid_n,),
        in_specs=[
            # Coefficients: whole (tiny) array in SMEM, no VMEM tile / DMA.
            pl.BlockSpec(memory_space=pltpu.MemorySpace.SMEM),
            # Inputs: [d, tile] windows marching along the lane axis.
            pl.BlockSpec((d, tile), lambda i: (0, i)),
        ],
        out_specs=pl.BlockSpec((1, tile), lambda i: (0, i)),
        compiler_params=pltpu.CompilerParams(
            dimension_semantics=("parallel",),   # shard grid across TCs (v7x)
            vmem_limit_bytes=32 * 1024 * 1024,   # safe on v5e/v6e/v7x
        ),
    )(params, x_t)

    return out[0, :N]


def reference_cost_model(x_norm, lb_block, range_block, quad_w, lin_w, const):
    """Pure-JAX reference matching the PyTorch forward (with the synthetic
    polynomial standing in for _get_block_info)."""
    n_block = lb_block.shape[0]
    x_block = lb_block[None, :] + x_norm[:, :n_block] * range_block[None, :]
    x_int = jnp.round(x_block.astype(jnp.float32))
    return (jnp.sum(quad_w[None, :] * x_int * x_int + lin_w[None, :] * x_int,
                    axis=-1) + const).astype(x_norm.dtype)


if __name__ == "__main__":
    # Synthetic "optimizer" setup (deterministic, built in-script):
    #   d = 8 total decision dims, of which n_block = 4 are block params.
    N = 300        # number of candidate configs (not a multiple of 128 -> pads)
    d = 8          # total normalized dims

    # bounds for the block params: lb = [1, 2, 4, 8], ub = [8, 16, 32, 64]
    lb_block = jnp.array([1.0, 2.0, 4.0, 8.0], dtype=jnp.float32)
    ub_block = jnp.array([8.0, 16.0, 32.0, 64.0], dtype=jnp.float32)
    range_block = ub_block - lb_block
    range_block = jnp.where(range_block == 0.0, 1.0, range_block)

    # Synthetic cost-table coefficients (stand-in for _get_block_info).
    quad_w = jnp.array([0.50, 0.25, 0.10, 0.05], dtype=jnp.float32)
    lin_w = jnp.array([2.0, -1.0, 0.5, 0.125], dtype=jnp.float32)
    const = 3.0

    # Normalized inputs in [0, 1], as the module expects.
    key = jax.random.PRNGKey(0)
    x_norm = jax.random.uniform(key, (N, d), dtype=jnp.float32)

    # Small tile here so the test actually exercises a multi-step pipelined
    # grid; production default is tile_n=2048.
    costs = pallas_cost_model(x_norm, lb_block, range_block, quad_w, lin_w,
                              const, tile_n=128)
    costs = jax.block_until_ready(costs)

    ref = reference_cost_model(x_norm, lb_block, range_block, quad_w, lin_w,
                               const)
    assert costs.shape == (N,)
    assert jnp.allclose(costs, ref, rtol=1e-5, atol=1e-5), (costs, ref)

    print("KERNEL_OK")
</pallas_src>

<mosaic_0001>
module attributes {stable_mosaic.version = 11 : i64} {
  func.func @_cost_kernel(%arg0: i32, %arg1: memref<17xf32, #tpu.memory_space<smem>>, %arg2: memref<8x128xf32, #tpu.memory_space<vmem>>, %arg3: memref<1x128xf32, #tpu.memory_space<vmem>>) attributes {dimension_semantics = [#tpu.dimension_semantics<parallel>], iteration_bounds = array<i64: 3>, scalar_prefetch = 0 : i64, scratch_operands = 0 : i64, tpu.core_type = #tpu.core_type<tc>, window_params = [{transform_indices = @transform_0, window_bounds = array<i64: 17>}, {transform_indices = @transform_1, window_bounds = array<i64: 8, 128>}, {transform_indices = @transform_2, window_bounds = array<i64: 1, 128>}]} {
    %cst = arith.constant 0.000000e+00 : f32
    %0 = vector.broadcast %cst : f32 to vector<1x128xf32>
    %c0 = arith.constant 0 : index
    %1 = memref.load %arg1[%c0] : memref<17xf32, #tpu.memory_space<smem>>
    %c4 = arith.constant 4 : index
    %2 = memref.load %arg1[%c4] : memref<17xf32, #tpu.memory_space<smem>>
    %c8 = arith.constant 8 : index
    %3 = memref.load %arg1[%c8] : memref<17xf32, #tpu.memory_space<smem>>
    %c12 = arith.constant 12 : index
    %4 = memref.load %arg1[%c12] : memref<17xf32, #tpu.memory_space<smem>>
    %c0_0 = arith.constant 0 : index
    %c0_1 = arith.constant 0 : index
    %5 = vector.load %arg2[%c0_0, %c0_1] : memref<8x128xf32, #tpu.memory_space<vmem>>, vector<1x128xf32>
    %6 = vector.broadcast %2 : f32 to vector<1x128xf32>
    %7 = arith.mulf %5, %6 : vector<1x128xf32>
    %8 = vector.broadcast %1 : f32 to vector<1x128xf32>
    %9 = arith.addf %8, %7 : vector<1x128xf32>
    %10 = math.roundeven %9 : vector<1x128xf32>
    %11 = vector.broadcast %3 : f32 to vector<1x128xf32>
    %12 = arith.mulf %11, %10 : vector<1x128xf32>
    %13 = arith.mulf %12, %10 : vector<1x128xf32>
    %14 = arith.addf %0, %13 : vector<1x128xf32>
    %15 = vector.broadcast %4 : f32 to vector<1x128xf32>
    %16 = arith.mulf %15, %10 : vector<1x128xf32>
    %17 = arith.addf %14, %16 : vector<1x128xf32>
    %c1 = arith.constant 1 : index
    %18 = memref.load %arg1[%c1] : memref<17xf32, #tpu.memory_space<smem>>
    %c5 = arith.constant 5 : index
    %19 = memref.load %arg1[%c5] : memref<17xf32, #tpu.memory_space<smem>>
    %c9 = arith.constant 9 : index
    %20 = memref.load %arg1[%c9] : memref<17xf32, #tpu.memory_space<smem>>
    %c13 = arith.constant 13 : index
    %21 = memref.load %arg1[%c13] : memref<17xf32, #tpu.memory_space<smem>>
    %c1_2 = arith.constant 1 : index
    %c0_3 = arith.constant 0 : index
    %22 = vector.load %arg2[%c1_2, %c0_3] : memref<8x128xf32, #tpu.memory_space<vmem>>, vector<1x128xf32>
    %23 = vector.broadcast %19 : f32 to vector<1x128xf32>
    %24 = arith.mulf %22, %23 : vector<1x128xf32>
    %25 = vector.broadcast %18 : f32 to vector<1x128xf32>
    %26 = arith.addf %25, %24 : vector<1x128xf32>
    %27 = math.roundeven %26 : vector<1x128xf32>
    %28 = vector.broadcast %20 : f32 to vector<1x128xf32>
    %29 = arith.mulf %28, %27 : vector<1x128xf32>
    %30 = arith.mulf %29, %27 : vector<1x128xf32>
    %31 = arith.addf %17, %30 : vector<1x128xf32>
    %32 = vector.broadcast %21 : f32 to vector<1x128xf32>
    %33 = arith.mulf %32, %27 : vector<1x128xf32>
    %34 = arith.addf %31, %33 : vector<1x128xf32>
    %c2 = arith.constant 2 : index
    %35 = memref.load %arg1[%c2] : memref<17xf32, #tpu.memory_space<smem>>
    %c6 = arith.constant 6 : index
    %36 = memref.load %arg1[%c6] : memref<17xf32, #tpu.memory_space<smem>>
    %c10 = arith.constant 10 : index
    %37 = memref.load %arg1[%c10] : memref<17xf32, #tpu.memory_space<smem>>
    %c14 = arith.constant 14 : index
    %38 = memref.load %arg1[%c14] : memref<17xf32, #tpu.memory_space<smem>>
    %c2_4 = arith.constant 2 : index
    %c0_5 = arith.constant 0 : index
    %39 = vector.load %arg2[%c2_4, %c0_5] : memref<8x128xf32, #tpu.memory_space<vmem>>, vector<1x128xf32>
    %40 = vector.broadcast %36 : f32 to vector<1x128xf32>
    %41 = arith.mulf %39, %40 : vector<1x128xf32>
    %42 = vector.broadcast %35 : f32 to vector<1x128xf32>
    %43 = arith.addf %42, %41 : vector<1x128xf32>
    %44 = math.roundeven %43 : vector<1x128xf32>
    %45 = vector.broadcast %37 : f32 to vector<1x128xf32>
    %46 = arith.mulf %45, %44 : vector<1x128xf32>
    %47 = arith.mulf %46, %44 : vector<1x128xf32>
    %48 = arith.addf %34, %47 : vector<1x128xf32>
    %49 = vector.broadcast %38 : f32 to vector<1x128xf32>
    %50 = arith.mulf %49, %44 : vector<1x128xf32>
    %51 = arith.addf %48, %50 : vector<1x128xf32>
    %c3 = arith.constant 3 : index
    %52 = memref.load %arg1[%c3] : memref<17xf32, #tpu.memory_space<smem>>
    %c7 = arith.constant 7 : index
    %53 = memref.load %arg1[%c7] : memref<17xf32, #tpu.memory_space<smem>>
    %c11 = arith.constant 11 : index
    %54 = memref.load %arg1[%c11] : memref<17xf32, #tpu.memory_space<smem>>
    %c15 = arith.constant 15 : index
    %55 = memref.load %arg1[%c15] : memref<17xf32, #tpu.memory_space<smem>>
    %c3_6 = arith.constant 3 : index
    %c0_7 = arith.constant 0 : index
    %56 = vector.load %arg2[%c3_6, %c0_7] : memref<8x128xf32, #tpu.memory_space<vmem>>, vector<1x128xf32>
    %57 = vector.broadcast %53 : f32 to vector<1x128xf32>
    %58 = arith.mulf %56, %57 : vector<1x128xf32>
    %59 = vector.broadcast %52 : f32 to vector<1x128xf32>
    %60 = arith.addf %59, %58 : vector<1x128xf32>
    %61 = math.roundeven %60 : vector<1x128xf32>
    %62 = vector.broadcast %54 : f32 to vector<1x128xf32>
    %63 = arith.mulf %62, %61 : vector<1x128xf32>
    %64 = arith.mulf %63, %61 : vector<1x128xf32>
    %65 = arith.addf %51, %64 : vector<1x128xf32>
    %66 = vector.broadcast %55 : f32 to vector<1x128xf32>
    %67 = arith.mulf %66, %61 : vector<1x128xf32>
    %68 = arith.addf %65, %67 : vector<1x128xf32>
    %c16 = arith.constant 16 : index
    %69 = memref.load %arg1[%c16] : memref<17xf32, #tpu.memory_space<smem>>
    %70 = vector.broadcast %69 : f32 to vector<1x128xf32>
    %71 = arith.addf %68, %70 : vector<1x128xf32>
    %c0_8 = arith.constant 0 : index
    %c0_9 = arith.constant 0 : index
    %72 = vector.load %arg3[%c0_8, %c0_9] : memref<1x128xf32, #tpu.memory_space<vmem>>, vector<1x128xf32>
    tpu.vector_store %arg3[%c0_8, %c0_9], %71 {strides = array<i32>} : memref<1x128xf32, #tpu.memory_space<vmem>>, vector<1x128xf32>,
    return
  }
  func.func @transform_0(%arg0: i32) -> i32 {
    %c0_i32 = arith.constant 0 : i32
    %c0_i32_0 = arith.constant 0 : i32
    return %c0_i32 : i32
  }
  func.func @transform_1(%arg0: i32) -> (i32, i32) {
    %c0_i32 = arith.constant 0 : i32
    %c0_i32_0 = arith.constant 0 : i32
    return %c0_i32, %arg0 : i32, i32
  }
  func.func @transform_2(%arg0: i32) -> (i32, i32) {
    %c0_i32 = arith.constant 0 : i32
    %c0_i32_0 = arith.constant 0 : i32
    return %c0_i32, %arg0 : i32, i32
  }
}

</mosaic_0001>

<bundles_post_ra>
// kernel: tpu_custom_call.1
= control target key start
LH: loop header
LB: loop body
LE: loop exit
PB: predicated region body
PF: predicated region fallthrough
CT: control target
= control target key end

     0   :  { %7 = vsyncpa [#allocation5], 0  ;;  %s761_s0 = inlined_call_operand.hbm [shape: f32[17], index: 0, kind: input, shape index: {}]   ;;  %s762_s1 = inlined_call_operand.hbm [shape: f32[8,384], index: 1, kind: input, shape index: {}]   ;;  %s763_s2 = inlined_call_operand.hbm [shape: f32[1,384], index: 2, kind: output, shape index: {}]  }
   0x1   :  { %8 = vsyncpa [#allocation3], 0 }
   0x2   :  { %10 = vsyncpa [#allocation3 + $0x1], 0 }
   0x3   :  { %11 = vsyncpa [#allocation4], 0 }
   0x4   :  { %13 = vsyncpa [#allocation4 + $0x1], 0  ;;  %s577_s9 = smov 0   ;;  %s579_s10 = smov 0  }
   0x5   :  { %s581_s11 = smov 0   ;;  %s583_s12 = smov 0  }
   0x6 LB: > { %s598_s13 = sadd.s32 4294967295, %s557_s12   ;;  %s333_s14 = sadd.s32 4294967294, %s557_s12   ;;  %s557_s12 = sphi %s583_s12, %s782_s12   ;;  %s553_s11 = sphi %s581_s11, %s781_s11   ;;  %s549_s10 = sphi %s579_s10, %s780_s10   ;;  %s545_s9 = sphi %s577_s9, %s779_s9  }
   0x7   : > { %p60_p0 = scmp.ne.s32.totalorder %s549_s10, %s545_s9  ;;  %p764_p1 = scmp.eq.s32.totalorder %s598_s13, 0 }
   0x8   : > { %p84_p2 = scmp.eq.s32.totalorder %s598_s13, 2  ;;  %p90_p3 = scmp.eq.s32.totalorder %s333_s14, 2 }
   0x9   : > { %p607_p4 = por %p764_p1, %p60_p0  ;;  %p334_p5 = scmp.ge.s32.totalorder %s557_s12, 1 }
   0xa   : > { %p612_p6 = por %p90_p3, %p60_p0  ;;  %p97_p7 = scmp.lt.s32.totalorder %s557_s12, 4 }
   0xb   : > { %s768_s15 = scalar_select %p607_p4, 1, 0 }
   0xc   : > { %s769_s16 = scalar_select %p612_p6, 1, 0 }
   0xd   : > { %p617_p8 = pnand %p334_p5, %p97_p7  ;;  %s622_s18 = sadd.s32 1, %s557_s12  }
   0xe   : > { %s44_s19 = ssub.s32 %s557_s12, %s622_s18  ;;  %s47_s20 = sadd.s32 1, %s553_s11 }
   0xf   : > { %s770_s17 = scalar_select %p617_p8, 1, 0 }
  0x10   : > { %p401_p9 = pneg %p617_p8  ;;  %p45_p11 = scmp.eq.s32.totalorder %s44_s19, 0 }
  0x11   : > { %p54_p12 = scmp.ne.s32.totalorder %s553_s11, %s549_s10  ;;  %p55_p13 = scmp.eq.s32.totalorder %s557_s12, 0 }
  0x12   : > { %p402_p10 = pnand %p401_p9, %p764_p1  ;;  %p414_p0 = scmp.lt.s32.totalorder %s557_s12, 3 }
  0x13   : > { %s559_s21 = smov [#allocation2]   ;;  %p56_p3 = por %p55_p13, %p54_p12 }
  0x14   : > { %404 = dma.hbm_to_smem (!%p402_p10), %s761_s0, 16, %s559_s21, [#allocation5]  }
  0x15   : > { %s639_s24 = scalar_select %p45_p11, %s553_s11, %s47_s20  }
  0x16   : > { %p643_p5 = por %p84_p2, %p54_p12  ;;  %s119_s26 = sand.u32 1, %s553_s11  }
  0x17   : > { %s338_s27 = sshll.u32 %s557_s12, 7  ;;  %s337_s28 = sshll.u32 %s119_s26, 3 }
  0x18   : > { %s771_s25 = scalar_select %p643_p5, 1, 0 }
  0x19   : > { %s652_s3 = scalar_lea.hbm %s762_s1, %s338_s27  ;;  %s123_s4 = scalar_lea.vmem [#allocation6], %s337_s28 }
  0x1a   : > { %s130_s5 = sshll.u32 %s123_s4, 4  ;;  %p654_p7 = pnand %p414_p0, %p56_p3  ;;  %s131_s5 = int_to_ptr.vmem [resolvable:$true] %s130_s5 }
  0x1b   : > { %s120_s7 = scalar_lea.sflag [#allocation3], %s119_s26  ;;  %s461_s8 = scalar_lea.hbm %s652_s3, 128 }
  0x1c   : > { %p462_p2 = scmp.ne.s32.totalorder %s652_s3, %s461_s8  ;;  %p463_p9 = pneg %p654_p7 }
  0x1d   : > { %s466_s20 = scalar_lea.hbm %s762_s1, 384  ;;  %p467_p12 = scmp.lt.s32.totalorder %s652_s3, %s762_s1 }
  0x1e   : > { %p464_p10 = pnand %p463_p9, %p462_p2  ;;  %p468_p13 = scmp.lt.s32.totalorder %s466_s20, %s461_s8 }
  0x20   : > { %p465_p11 = pneg %p464_p10  ;;  %p469_p0 = por %p468_p13, %p467_p12 }
  0x22   : > { %p470_p3 = pnand %p469_p0, %p465_p11 }
  0x24   : > { %473 = shalt.err (!%p470_p3)
}
  0x25   : > { %s474_s23 = scalar_lea.vmem %s131_s5, 128  ;;  %s560_s26 = smov [#allocation6]  }
  0x26   : > { %p475_p1 = scmp.ne.s32.totalorder %s131_s5, %s474_s23  ;;  %s479_s27 = sshll.u32 %s560_s26, 4  ;;  %s480_s27 = int_to_ptr.vmem [resolvable:$false] %s479_s27 }
  0x27   : > { %s481_s28 = scalar_lea.vmem %s480_s27, 256  ;;  %p482_p2 = scmp.lt.s32.totalorder %s131_s5, %s480_s27 }
  0x28   : > { %p477_p6 = pnand %p475_p1, %p463_p9  ;;  %p483_p10 = scmp.lt.s32.totalorder %s481_s28, %s474_s23 }
  0x2a   : > { %p478_p5 = pneg %p477_p6  ;;  %p484_p4 = por %p483_p10, %p482_p2 }
  0x2c   : > { %p485_p8 = pnand %p484_p4, %p478_p5 }
  0x2e   : > { %488 = shalt.err (!%p485_p8)
}
  0x2f   : > { %408 = dma.hbm_to_vmem [thread:$0]  (!%p654_p7), %s652_s3, 128, %s131_s5, %s120_s7  }
  0x30   : > { %p773_p11 = scmp.ne.s32.totalorder %s770_s17, 0 }
  0x31   : > { %p774_p12 = scmp.eq.s32.totalorder (!%p773_p11), %s598_s13, 0 }
  0x32   : > { %139 = sbr.rel (%p773_p11) target bundleno = 117 (0x75), region = 28 }
  0x37   : > { %532 = dma.done.wait (%p774_p12), [#allocation5], 16   ;;  %p775_p1 = pmov %p774_p12 }
  0x38   : > { %s679_s29 = sand.u32 1, %s549_s10   ;;  %p776_p4 = scmp.ne.s32.totalorder %s768_s15, 0 }
  0x39   : > { %534 = vsyncadd (%p775_p1), [#allocation5], 4294967280  ;;  %s341_s30 = sshll.u32 %s679_s29, 3  ;;  %s146_s4 = scalar_lea.sflag [#allocation3], %s679_s29 }
  0x3a   : > { %s683_s6 = scalar_lea.vmem [#allocation6], %s341_s30 }
  0x3b   : > { %536 = dma.done.wait (%p776_p4), %s146_s4, 128  }
  0x3c   : > { %538 = vsyncadd (%p776_p4), %s146_s4, 4294967168 }
  0x3d   : > { %154 = sfence }
  0x3e   : > { %s170_s17 = sld [smem:[#allocation2]]  ;;  %v174_v0 = vld [vmem:[%s683_s6] sm:$0x1]  ;;  %v191_v4 = vld [vmem:[%s683_s6 + $0x1] sm:$0x1]  ;;  %p777_p8 = scmp.ne.s32.totalorder %s771_s25, 0 }
  0x3f   : > { %s342_s3 = sld [smem:[#allocation2 + $0x4]]  ;;  %v208_v14 = vld [vmem:[%s683_s6 + $0x2] sm:$0x1]  ;;  %v225_v22 = vld [vmem:[%s683_s6 + $0x3] sm:$0x1]  ;;  %s169_s6 = scalar_lea.vmem [#allocation7], %s679_s29 }
  0x40   : > { %s345_s5 = sld [smem:[#allocation2 + $0x1]] }
  0x41   : > { %s346_s7 = sld [smem:[#allocation2 + $0x5]] }
  0x42   : > { %s690_s8 = sld [smem:[#allocation2 + $0x8]] }
  0x43   : > { %s692_s14 = sld [smem:[#allocation2 + $0x2]] }
  0x44   : > { %v177_v2 = vstv %s170_s17  ;;  %s350_s19 = sld [smem:[#allocation2 + $0x6]]  ;;  %s255_s17 = sshll.u32 %s169_s6, 4  ;;  %s722_s17 = int_to_ptr.vmem [resolvable:$true] %s255_s17 }
  0x45   : > { %v175_v1 = vstv %s342_s3  ;;  %s695_s15 = sld [smem:[#allocation2 + $0xc]]  ;;  %s358_s3 = sshll.u32 %s598_s13, 4 }
  0x46   : > { %v176_v3 = vmul.f32 %v175_v1, %v174_v0  ;;  %v194_v7 = vstv %s345_s5  ;;  %s697_s20 = sld [smem:[#allocation2 + $0x3]] }
  0x47   : > { %v192_v6 = vstv %s346_s7  ;;  %s354_s21 = sld [smem:[#allocation2 + $0x7]] }
  0x48   : > { %v178_v5 = vadd.f32 %v177_v2, %v176_v3  ;;  %v193_v9 = vmul.f32 %v192_v6, %v191_v4  ;;  %s699_s22 = sld [smem:[#allocation2 + $0x9]]  ;;  %v180_v19 = vstv %s690_s8  ;;  %s253_s8 = scalar_lea.hbm %s763_s2, %s358_s3 }
  0x49   : > { %s702_s23 = sld [smem:[#allocation2 + $0xd]]  ;;  %v211_v18 = vstv %s692_s14  ;;  %s243_s14 = scalar_lea.sflag [#allocation4], %s679_s29 }
  0x4a   : > { %v363_v8 = vcvt.f32.s32 %v178_v5  ;;  %v361_v10 = vand.u32 2147483647, %v178_v5  ;;  %v366_v12 = vand.u32 2147483648, %v178_v5  ;;  %v195_v13 = vadd.f32 %v194_v7, %v193_v9  ;;  %s708_s26 = sld [smem:[#allocation2 + $0xa]] }
  0x4b   : > { %v209_v15 = vstv %s350_s19  ;;  %v184_v24 = vstv %s695_s15  ;;  %s711_s27 = sld [smem:[#allocation2 + $0xe]]  ;;  %s489_s19 = scalar_lea.vmem %s722_s17, 16 }
  0x4c   : > { %v364_v11 = vcvt.s32.f32 %v363_v8  ;;  %v371_v17 = vcvt.f32.s32 %v195_v13  ;;  %vm362_vm0 = vcmp.lt.f32.partialorder %v361_v10, 8388608.0  ;;  %v369_v20 = vand.u32 2147483647, %v195_v13  ;;  %s714_s28 = sld [smem:[#allocation2 + $0xb]]  ;;  %p490_p6 = scmp.ne.s32.totalorder %s722_s17, %s489_s19 }
  0x4d   : > { %v210_v21 = vmul.f32 %v209_v15, %v208_v14  ;;  %v374_v26 = vand.u32 2147483648, %v195_v13  ;;  %v226_v28 = vstv %s354_s21  ;;  %v228_v29 = vstv %s697_s20  ;;  %s356_s30 = sld [smem:[#allocation2 + $0xf]]  ;;  %s561_s15 = smov [#allocation7]  }
  0x4e   : > { %v365_v16 = vand.u32 2147483647, %v364_v11  ;;  %v372_v25 = vcvt.s32.f32 %v371_v17  ;;  %v227_v32 = vmul.f32 %v226_v28, %v225_v22  ;;  %vm370_vm1 = vcmp.lt.f32.partialorder %v369_v20, 8388608.0  ;;  %s357_s4 = sld [smem:[#allocation2 + $0x10]]  ;;  %p491_p5 = pnand %p490_p6, %p777_p8 }
  0x4f   : > { %v212_v27 = vadd.f32 %v211_v18, %v210_v21  ;;  %v197_v37 = vstv %s699_s22  ;;  %v201_v44 = vstv %s702_s23  ;;  %s493_s13 = sshll.u32 %s561_s15, 4  ;;  %s494_s13 = int_to_ptr.vmem [resolvable:$false] %s493_s13 }
  0x50   : > { %v367_v23 = vor.u32 %v366_v12, %v365_v16  ;;  %v373_v31 = vand.u32 2147483647, %v372_v25  ;;  %v229_v39 = vadd.f32 %v228_v29, %v227_v32  ;;  %v214_v55 = vstv %s708_s26  ;;  %p492_p7 = pneg %p491_p5  ;;  %s495_s20 = scalar_lea.vmem %s494_s13, 32 }
  0x51   : > { %v379_v35 = vcvt.f32.s32 %v212_v27  ;;  %v377_v38 = vand.u32 2147483647, %v212_v27  ;;  %v382_v42 = vand.u32 2147483648, %v212_v27  ;;  %v218_v59 = vstv %s711_s27  ;;  %p496_p9 = scmp.lt.s32.totalorder %s722_s17, %s494_s13  ;;  %p497_p13 = scmp.lt.s32.totalorder %s495_s20, %s489_s19 }
  0x52   : > { %v368_v30 = vsel %vm362_vm0, %v367_v23, %v178_v5  ;;  %v375_v36 = vor.u32 %v374_v26, %v373_v31  ;;  %v387_v45 = vcvt.f32.s32 %v229_v39  ;;  %v385_v49 = vand.u32 2147483647, %v229_v39 }
  0x53   : > { %v181_v33 = vmul.f32 %v368_v30, %v180_v19  ;;  %v185_v34 = vmul.f32 %v368_v30, %v184_v24  ;;  %v380_v41 = vcvt.s32.f32 %v379_v35  ;;  %vm378_vm2 = vcmp.lt.f32.partialorder %v377_v38, 8388608.0  ;;  %p498_p0 = por %p497_p13, %p496_p9 }
  0x54   : > { %v376_v43 = vsel %vm370_vm1, %v375_v36, %v195_v13  ;;  %v388_v50 = vcvt.s32.f32 %v387_v45  ;;  %v390_v51 = vand.u32 2147483648, %v229_v39  ;;  %vm386_vm3 = vcmp.lt.f32.partialorder %v385_v49, 8388608.0 }
  0x55   : > { %v182_v40 = vmul.f32 %v368_v30, %v181_v33  ;;  %v198_v47 = vmul.f32 %v376_v43, %v197_v37  ;;  %v381_v48 = vand.u32 2147483647, %v380_v41  ;;  %v202_v53 = vmul.f32 %v376_v43, %v201_v44  ;;  %p499_p3 = pnand %p498_p0, %p492_p7 }
  0x56   : > { %v389_v56 = vand.u32 2147483647, %v388_v50  ;;  %v231_v62 = vstv %s714_s28  ;;  %v235_v4 = vstv %s356_s30  ;;  %v239_v10 = vstv %s357_s4 }
  0x57   : > { %v186_v46 = vadd.f32 %v185_v34, %v182_v40  ;;  %v199_v52 = vmul.f32 %v376_v43, %v198_v47  ;;  %v383_v54 = vor.u32 %v382_v42, %v381_v48 }
  0x58   : > { %v391_v61 = vor.u32 %v390_v51, %v389_v56 }
  0x59   : > { %v200_v57 = vadd.f32 %v199_v52, %v186_v46  ;;  %v384_v58 = vsel %vm378_vm2, %v383_v54, %v212_v27 }
  0x5a   : > { %v215_v60 = vmul.f32 %v384_v58, %v214_v55  ;;  %v219_v1 = vmul.f32 %v384_v58, %v218_v59  ;;  %v392_v2 = vsel %vm386_vm3, %v391_v61, %v229_v39 }
  0x5b   : > { %v203_v63 = vadd.f32 %v202_v53, %v200_v57  ;;  %v232_v3 = vmul.f32 %v392_v2, %v231_v62  ;;  %v236_v8 = vmul.f32 %v392_v2, %v235_v4 }
  0x5c   : > { %v216_v0 = vmul.f32 %v384_v58, %v215_v60 }
  0x5d   : > { %v233_v6 = vmul.f32 %v392_v2, %v232_v3 }
  0x5e   : > { %v217_v5 = vadd.f32 %v216_v0, %v203_v63 }
  0x60   : > { %v220_v7 = vadd.f32 %v219_v1, %v217_v5 }
  0x62   : > { %v234_v9 = vadd.f32 %v233_v6, %v220_v7 }
  0x64   : > { %v237_v11 = vadd.f32 %v236_v8, %v234_v9 }
  0x66   : > { %v240_v12 = vadd.f32 %v239_v10, %v237_v11 }
  0x68   : > { %241 = vst [vmem:[%s169_s6] sm:$0x1] %v240_v12 }
  0x69   : > { %502 = shalt.err (!%p499_p3)
}
  0x6a   : > { %s503_s21 = scalar_lea.hbm %s253_s8, 16  ;;  %s507_s23 = scalar_lea.hbm %s763_s2, 48 }
  0x6b   : > { %p504_p2 = scmp.ne.s32.totalorder %s253_s8, %s503_s21  ;;  %p508_p12 = scmp.lt.s32.totalorder %s253_s8, %s763_s2 }
  0x6c   : > { %p509_p1 = scmp.lt.s32.totalorder %s507_s23, %s503_s21 }
  0x6d   : > { %p505_p10 = pnand %p504_p2, %p777_p8 }
  0x6e   : > { %p510_p4 = por %p509_p1, %p508_p12 }
  0x6f   : > { %p506_p11 = pneg %p505_p10 }
  0x71   : > { %p511_p6 = pnand %p510_p4, %p506_p11 }
  0x73   : > { %514 = shalt.err (!%p511_p6)
}
  0x74   : > { %399 = dma.vmem_to_hbm [thread:$0]  (%p777_p8), %s722_s17, 16, %s253_s8, %s243_s14  }
  0x75 PF: > { %p416_p5 = scmp.ge.s32.totalorder %s557_s12, 2  ;;  %s267_s28 = sand.u32 1, %s545_s9  }
  0x76   : > { %p778_p7 = scmp.ne.s32.totalorder %s769_s16, 0  ;;  %s268_s30 = scalar_lea.sflag [#allocation4], %s267_s28 }
  0x78   : > { %p410_p9 = pnand %p416_p5, %p778_p7 }
  0x7a   : > { %p411_p13 = pneg %p410_p9 }
  0x7c   : > { %540 = dma.done.wait (%p411_p13), %s268_s30, 16  }
  0x7d   : > { %542 = vsyncadd (%p411_p13), %s268_s30, 4294967280  ;;  %p16_p0 = scmp.ge.s32.totalorder %s622_s18, 5   ;;  %s779_s9 = smov %s549_s10 }
  0x7e   : > { %s780_s10 = smov %s553_s11  ;;  %s781_s11 = smov %s639_s24 }
  0x7f   : > { %s782_s12 = smov %s622_s18  ;;  %18 = sbr.rel (!%p16_p0) target bundleno = 6 (0x6), region = 78 }
  0x84   :  { %272 = vsyncpa [#allocation3], 1 }
  0x85   :  { %274 = vsyncpa [#allocation3 + $0x1], 1 }
  0x86   :  { %275 = vsyncpa [#allocation4], 1 }
  0x87   :  { %277 = vsyncpa [#allocation4 + $0x1], 1 }
  0x88   :  { %278 = vsyncpa [#allocation5], 1 }
  0x89   :  { %280 = vsyncpa [#allocation5 + $0x1], 1 }

</bundles_post_ra>
